<compile_context>
chip_gen: v7x
topology: tpu7x:2x2x1
jax: 0.10.0
libtpu: 0.0.40
codegen_flags: <defaults>
</compile_context>

<pallas_src>
import jax
import jax.numpy as jnp
from jax.experimental import pallas as pl
from jax.experimental.pallas import tpu as pltpu


# Below this many bytes the XLA fused elementwise path beats kernel launch cost.
_MIN_PALLAS_BYTES = 128 * 1024
# Candidate lane widths (all multiples of 128), widest first for lane-density.
_LANE_CANDIDATES = (8192, 4096, 2048, 1024, 512, 256, 128)


def _cdiv(a, b):
    return (a + b - 1) // b


def _round_up(a, b):
    return _cdiv(a, b) * b


def _chip_config():
    """Per-generation block-size target, scoped-VMEM limit, native-bf16 flag."""
    try:
        kind = jax.devices()[0].device_kind.lower()
    except Exception:  # no device visible at trace time -> conservative defaults
        kind = ""
    if "v7" in kind or "7x" in kind or "tpu7" in kind:
        # v7x: ~3.2 TB/s HBM per TC -> big blocks; 64 MiB physical VMEM per TC,
        # so raise the scoped limit (8 MiB block * in+out * double buffer = 32 MiB).
        return dict(target_block_bytes=8 << 20, vmem_limit_bytes=48 << 20,
                    native_bf16=True)
    if "v6" in kind:
        return dict(target_block_bytes=4 << 20, vmem_limit_bytes=64 << 20,
                    native_bf16=True)
    if "v5" in kind:
        # v5e default scoped VMEM is only 16 MiB: keep 2 MiB blocks (8 MiB peak).
        return dict(target_block_bytes=2 << 20, vmem_limit_bytes=None,
                    native_bf16=False)
    # Unknown chip: conservative.
    return dict(target_block_bytes=2 << 20, vmem_limit_bytes=None,
                native_bf16=False)


def _sublane_align(dtype):
    bits = jnp.dtype(dtype).itemsize * 8
    if bits >= 32:
        return 8
    if bits == 16:
        return 16
    return 32


def _pick_lane(aligned_total, sublane):
    """Widest lane candidate that still yields >= one full sublane tile of rows;
    fall back to the widest divisor otherwise."""
    fallback = None
    for cand in _LANE_CANDIDATES:
        if aligned_total % cand == 0:
            if fallback is None:
                fallback = cand
            if aligned_total // cand >= sublane:
                return cand
    return fallback


def _balanced_tile_rows(rows, sublane, max_tile_rows):
    """Pick tile_rows (multiple of `sublane`, or == rows) minimizing the max
    rows landed on either TensorCore when the 1-D "parallel" grid axis is
    sharded across 2 cores; tie-break on fewer grid steps (per-step overhead).
    Only called for small grids, so the candidate set is tiny."""
    candidates = {min(rows, max_tile_rows)}
    for steps in range(2, 33, 2):  # even step counts split evenly across 2 TCs
        t = _round_up(_cdiv(rows, steps), sublane)
        if t <= max_tile_rows:
            candidates.add(min(t, rows))
    best_key, best_t = None, min(rows, max_tile_rows)
    for t in candidates:
        if t <= 0 or (t != rows and t % sublane != 0):
            continue
        steps = _cdiv(rows, t)
        per_core_rows = min(_cdiv(steps, 2) * t, rows)
        key = (per_core_rows, steps)
        if best_key is None or key < best_key:
            best_key, best_t = key, t
    return best_t


def _make_bias_kernel(compute_dtype):
    def _bias_kernel(alpha_ref, beta_ref, x_ref, o_ref):
        # alpha/beta: (1,1) f32 scalars in SMEM. x/o: lane-dense VMEM tiles.
        a = alpha_ref[0, 0].astype(compute_dtype)
        b = beta_ref[0, 0].astype(compute_dtype)
        o_ref[...] = (a * x_ref[...].astype(compute_dtype) + b).astype(o_ref.dtype)
    return _bias_kernel


def _affine_jnp(x, alpha, beta):
    a = jnp.asarray(alpha, dtype=jnp.float32).reshape(())
    b = jnp.asarray(beta, dtype=jnp.float32).reshape(())
    return (a * x.astype(jnp.float32) + b).astype(x.dtype)


def bias_layer(x, alpha, beta, *, force_pallas=False):
    """Computes alpha * x + beta elementwise (BiasLayer.forward)."""
    orig_shape = x.shape
    orig_dtype = x.dtype
    total = x.size
    if total == 0:
        return x

    itemsize = jnp.dtype(orig_dtype).itemsize

    # Small-input fast path: kernel launch overhead dwarfs the work.
    if (total * itemsize < _MIN_PALLAS_BYTES) and not force_pallas:
        return _affine_jnp(x, alpha, beta)

    aligned = (total // 128) * 128
    if aligned == 0:  # fewer than 128 elements even under force_pallas
        return _affine_jnp(x, alpha, beta)

    cfg = _chip_config()
    sublane = _sublane_align(orig_dtype)

    x_flat = jnp.reshape(x, (-1,))
    if aligned == total:
        head, tail = x_flat, None
    else:
        # Run the kernel on the 128-aligned prefix only; the <=127-element tail
        # is computed with plain jnp and stitched back (no full-array pad copy).
        head = jax.lax.slice(x_flat, (0,), (aligned,))
        tail = jax.lax.slice(x_flat, (aligned,), (total,))

    lane = _pick_lane(aligned, sublane)
    rows = aligned // lane
    x2d = jnp.reshape(head, (rows, lane))

    # ---- tile height: ~target_block_bytes per block, sublane-aligned ----
    row_bytes = lane * itemsize
    max_tile_rows = max(sublane,
                        (cfg["target_block_bytes"] // row_bytes) // sublane * sublane)
    tile_rows = min(max_tile_rows, rows)
    grid_steps = _cdiv(rows, tile_rows)
    # Small grids: rebalance so both TensorCores (megacore) get near-equal work.
    if grid_steps < 8 and rows >= 2 * sublane:
        tile_rows = _balanced_tile_rows(rows, sublane, max_tile_rows)
        grid_steps = _cdiv(rows, tile_rows)

    # Compute natively in bf16 on chips with bf16 VALUs; f32 otherwise.
    if orig_dtype == jnp.bfloat16 and cfg["native_bf16"]:
        compute_dtype = jnp.bfloat16
    else:
        compute_dtype = jnp.float32

    alpha2d = jnp.asarray(alpha, dtype=jnp.float32).reshape(1, 1)
    beta2d = jnp.asarray(beta, dtype=jnp.float32).reshape(1, 1)

    compiler_kwargs = dict(dimension_semantics=("parallel",))
    if cfg["vmem_limit_bytes"] is not None:
        compiler_kwargs["vmem_limit_bytes"] = cfg["vmem_limit_bytes"]

    out2d = pl.pallas_call(
        _make_bias_kernel(compute_dtype),
        out_shape=jax.ShapeDtypeStruct((rows, lane), orig_dtype),
        grid_spec=pltpu.PrefetchScalarGridSpec(
            num_scalar_prefetch=0,
            grid=(grid_steps,),
            in_specs=[
                pl.BlockSpec(memory_space=pltpu.SMEM),  # alpha (1,1)
                pl.BlockSpec(memory_space=pltpu.SMEM),  # beta  (1,1)
                pl.BlockSpec((tile_rows, lane), lambda i: (i, 0)),
            ],
            out_specs=pl.BlockSpec((tile_rows, lane), lambda i: (i, 0)),
        ),
        compiler_params=pltpu.CompilerParams(**compiler_kwargs),
        cost_estimate=pl.CostEstimate(
            flops=2 * aligned,
            bytes_accessed=2 * aligned * itemsize,
            transcendentals=0,
        ),
    )(alpha2d, beta2d, x2d)

    out_flat = jnp.reshape(out2d, (-1,))
    if tail is not None:
        out_flat = jnp.concatenate([out_flat, _affine_jnp(tail, alpha, beta)])
    return jnp.reshape(out_flat, orig_shape)


if __name__ == "__main__":
    key = jax.random.PRNGKey(0)

    # 1) Small NCHW-shaped input consistent with the module's typical usage.
    #    Deterministic parameter init matching BiasLayer.__init__ (alpha=1, beta=0).
    x = jax.random.normal(key, (2, 4, 16, 16), dtype=jnp.float32)
    alpha = jnp.ones((1,), dtype=jnp.float32)
    beta = jnp.zeros((1,), dtype=jnp.float32)
    out = jax.block_until_ready(bias_layer(x, alpha, beta, force_pallas=True))
    ref = alpha[0] * x + beta[0]
    assert out.shape == x.shape
    assert jnp.allclose(out, ref, atol=1e-6), "mismatch vs reference (identity)"

    # 2) Non-trivial alpha/beta, multi-step "parallel" grid path, wide lanes.
    x2 = jax.random.normal(jax.random.PRNGKey(0), (4, 8, 64, 64), dtype=jnp.float32)
    a2 = jnp.full((1,), 1.5, dtype=jnp.float32)
    b2 = jnp.full((1,), -0.25, dtype=jnp.float32)
    out2 = jax.block_until_ready(bias_layer(x2, a2, b2, force_pallas=True))
    ref2 = a2[0] * x2 + b2[0]
    assert out2.shape == x2.shape
    assert jnp.allclose(out2, ref2, atol=1e-5), "mismatch vs reference (affine)"

    # 3) Non-128-divisible element count: exercises the aligned-prefix + jnp-tail path.
    x3 = jax.random.normal(jax.random.PRNGKey(0), (3, 5, 7, 11), dtype=jnp.float32)
    out3 = jax.block_until_ready(bias_layer(x3, a2, b2, force_pallas=True))
    ref3 = a2[0] * x3 + b2[0]
    assert out3.shape == x3.shape
    assert jnp.allclose(out3, ref3, atol=1e-5), "mismatch vs reference (tail path)"

    print("KERNEL_OK")
</pallas_src>

<mosaic_0001>
module attributes {stable_mosaic.version = 11 : i64} {
  func.func @_bias_kernel(%arg0: i32, %arg1: memref<1x1xf32, #tpu.memory_space<smem>>, %arg2: memref<1x1xf32, #tpu.memory_space<smem>>, %arg3: memref<8x256xf32, #tpu.memory_space<vmem>>, %arg4: memref<8x256xf32, #tpu.memory_space<vmem>>) attributes {dimension_semantics = [#tpu.dimension_semantics<parallel>], iteration_bounds = array<i64: 1>, scalar_prefetch = 0 : i64, scratch_operands = 0 : i64, tpu.core_type = #tpu.core_type<tc>, window_params = [{transform_indices = @transform_0, window_bounds = array<i64: 1, 1>}, {transform_indices = @transform_1, window_bounds = array<i64: 1, 1>}, {transform_indices = @transform_2, window_bounds = array<i64: 8, 256>}, {transform_indices = @transform_3, window_bounds = array<i64: 8, 256>}]} {
    %c0 = arith.constant 0 : index
    %c0_0 = arith.constant 0 : index
    %0 = memref.load %arg1[%c0, %c0_0] : memref<1x1xf32, #tpu.memory_space<smem>>
    %c0_1 = arith.constant 0 : index
    %c0_2 = arith.constant 0 : index
    %1 = memref.load %arg2[%c0_1, %c0_2] : memref<1x1xf32, #tpu.memory_space<smem>>
    %c0_3 = arith.constant 0 : index
    %c0_4 = arith.constant 0 : index
    %2 = vector.load %arg3[%c0_3, %c0_4] : memref<8x256xf32, #tpu.memory_space<vmem>>, vector<8x256xf32>
    %3 = vector.broadcast %0 : f32 to vector<8x256xf32>
    %4 = arith.mulf %3, %2 : vector<8x256xf32>
    %5 = vector.broadcast %1 : f32 to vector<8x256xf32>
    %6 = arith.addf %4, %5 : vector<8x256xf32>
    %c0_5 = arith.constant 0 : index
    %c0_6 = arith.constant 0 : index
    %7 = vector.load %arg4[%c0_5, %c0_6] : memref<8x256xf32, #tpu.memory_space<vmem>>, vector<8x256xf32>
    tpu.vector_store %arg4[%c0_5, %c0_6], %6 {strides = array<i32>} : memref<8x256xf32, #tpu.memory_space<vmem>>, vector<8x256xf32>,
    return
  }
  func.func @transform_0(%arg0: i32) -> (i32, i32) {
    %c0_i32 = arith.constant 0 : i32
    %c0_i32_0 = arith.constant 0 : i32
    %c0_i32_1 = arith.constant 0 : i32
    return %c0_i32, %c0_i32_0 : i32, i32
  }
  func.func @transform_1(%arg0: i32) -> (i32, i32) {
    %c0_i32 = arith.constant 0 : i32
    %c0_i32_0 = arith.constant 0 : i32
    %c0_i32_1 = arith.constant 0 : i32
    return %c0_i32, %c0_i32_0 : i32, i32
  }
  func.func @transform_2(%arg0: i32) -> (i32, i32) {
    %c0_i32 = arith.constant 0 : i32
    %c0_i32_0 = arith.constant 0 : i32
    return %arg0, %c0_i32 : i32, i32
  }
  func.func @transform_3(%arg0: i32) -> (i32, i32) {
    %c0_i32 = arith.constant 0 : i32
    %c0_i32_0 = arith.constant 0 : i32
    return %arg0, %c0_i32 : i32, i32
  }
}

</mosaic_0001>

<bundles_post_ra>
// kernel: tpu_custom_call.1
= control target key start
LH: loop header
LB: loop body
LE: loop exit
PB: predicated region body
PF: predicated region fallthrough
CT: control target
= control target key end

     0   :  { %10 = vsyncpa [#allocation5], 0  ;;  %s158_s0 = inlined_call_operand.<no memory space> [shape: f32[1,1], index: 0, kind: input, shape index: {}]   ;;  %s159_s1 = inlined_call_operand.<no memory space> [shape: f32[1,1], index: 1, kind: input, shape index: {}]   ;;  %s160_s2 = inlined_call_operand.hbm [shape: f32[8,256], index: 2, kind: input, shape index: {}]   ;;  %s161_s3 = inlined_call_operand.hbm [shape: f32[8,256], index: 3, kind: output, shape index: {}]  }
   0x1   :  { %11 = vsyncpa [#allocation6], 0  ;;  %s106_s12 = smov [#allocation4]   ;;  %s58_s16 = scalar_lea.hbm %s160_s2, 256 }
   0x2   :  { %s22_s13 = sshll.u32 %s106_s12, 4  ;;  %p59_p0 = scmp.ne.s32.totalorder %s160_s2, %s58_s16  ;;  %s23_s13 = int_to_ptr.vmem [resolvable:$true] %s22_s13 }
   0x3   :  { %p62_p1 = scmp.lt.u32.totalorder %s58_s16, %s160_s2 }
   0x5   :  { %p64_p2 = pnand %p62_p1, %p59_p0 }
   0x7   :  { %67 = shalt.err (!%p64_p2)
}
   0x8   :  { %s68_s21 = scalar_lea.vmem %s23_s13, 256  ;;  %p73_p4 = scmp.lt.s32.totalorder %s23_s13, %s23_s13 }
   0x9   :  { %p69_p3 = scmp.ne.s32.totalorder %s23_s13, %s68_s21  ;;  %p74_p5 = scmp.lt.s32.totalorder %s68_s21, %s68_s21 }
   0xb   :  { %p75_p6 = por %p74_p5, %p73_p4 }
   0xd   :  { %p76_p7 = pnand %p75_p6, %p69_p3 }
   0xf   :  { %79 = shalt.err (!%p76_p7)
}
  0x10   :  { %25 = dma.hbm_to_vmem [thread:$0]  %s160_s2, 256, %s23_s13, [#allocation5]  }
  0x11   :  { %102 = dma.done.wait [#allocation5], 256  }
  0x12   :  { %103 = vsyncadd [#allocation5], 4294967040  ;;  %v33_v0 = vstv %s158_s0  ;;  %v31_v1 = vld [vmem:[#allocation4] sm:$0xff]  ;;  %v36_v2 = vstv %s159_s1  ;;  %v32_v3 = vld [vmem:[#allocation4 + $0x8] sm:$0xff]  ;;  %s107_s28 = smov [#allocation7]  }
  0x13   :  { %s47_s29 = sshll.u32 %s107_s28, 4  ;;  %v34_v4 = vmul.f32 %v33_v0, %v31_v1  ;;  %v35_v5 = vmul.f32 %v33_v0, %v32_v3  ;;  %s48_s29 = int_to_ptr.vmem [resolvable:$true] %s47_s29 }
  0x14   :  { %s80_s2 = scalar_lea.vmem %s48_s29, 256  ;;  %p85_p9 = scmp.lt.s32.totalorder %s48_s29, %s48_s29 }
  0x15   :  { %v37_v6 = vadd.f32 %v36_v2, %v34_v4  ;;  %v38_v7 = vadd.f32 %v36_v2, %v35_v5  ;;  %p81_p8 = scmp.ne.s32.totalorder %s48_s29, %s80_s2  ;;  %p86_p10 = scmp.lt.s32.totalorder %s80_s2, %s80_s2 }
  0x17   :  { %39 = vst [vmem:[#allocation7] sm:$0xff] %v37_v6  ;;  %40 = vst [vmem:[#allocation7 + $0x8] sm:$0xff] %v38_v7  ;;  %p87_p11 = por %p86_p10, %p85_p9 }
  0x19   :  { %p88_p12 = pnand %p87_p11, %p81_p8 }
  0x1b   :  { %91 = shalt.err (!%p88_p12)
}
  0x1c   :  { %s92_s1 = scalar_lea.hbm %s161_s3, 256 }
  0x1d   :  { %p93_p13 = scmp.ne.s32.totalorder %s161_s3, %s92_s1  ;;  %p96_p0 = scmp.lt.u32.totalorder %s92_s1, %s161_s3 }
  0x1f   :  { %p98_p1 = pnand %p96_p0, %p93_p13 }
  0x21   :  { %101 = shalt.err (!%p98_p1)
}
  0x22   :  { %50 = dma.vmem_to_hbm [thread:$0]  %s48_s29, 256, %s161_s3, [#allocation6]  }
  0x23   :  { %104 = dma.done.wait [#allocation6], 256  }
  0x24   :  { %105 = vsyncadd [#allocation6], 4294967040 }
  0x25   :  { %54 = vsyncpa [#allocation5], 1 }
  0x26   :  { %55 = vsyncpa [#allocation6], 1 }

</bundles_post_ra>
